<compile_context>
chip_gen: v5e
topology: v5e:2x2
jax: 0.10.0
libtpu: 0.0.40
codegen_flags: <defaults>
</compile_context>

<pallas_src>
import math
import functools

import jax
import jax.numpy as jnp
from jax.experimental import pallas as pl
from jax.experimental.pallas import tpu as pltpu


def _round_up(x, m):
    return (x + m - 1) // m * m


def _cdiv(a, b):
    return (a + b - 1) // b


def _softplus(x):
    # Numerically stable softplus (never overflows for large positive rho).
    # Identical to log1p(exp(x)) for x <= 0.
    return jnp.maximum(x, 0.0) + jnp.log1p(jnp.exp(-jnp.abs(x)))


def _log_softplus(x, sp=None):
    # Stable log(softplus(x)): for very negative x, softplus(x) ~= exp(x)
    # underflows to 0 and log() would give -inf (-> inf-inf NaN in the KL).
    if sp is None:
        sp = _softplus(x)
    return jnp.where(x < -20.0, x, jnp.log(jnp.maximum(sp, 1e-38)))


# ----------------------------------------------------------------------------
# Kernel 1: fused sample + linear
#   W = w_mu + softplus(w_rho) * eps_w   (sampled per (tn, tk) tile, in VMEM)
#   y = x @ W.T + b_sample
# ----------------------------------------------------------------------------
def _fused_linear_kernel(x_ref, wmu_ref, wrho_ref, weps_ref, b_ref,
                         o_ref, acc_ref):
    k = pl.program_id(2)

    @pl.when(k == 0)
    def _init():
        acc_ref[...] = jnp.zeros_like(acc_ref)

    # Sample the weight tile in VMEM (no HBM round-trip). eps arrives as bf16.
    sigma_w = _softplus(wrho_ref[...])
    w_tile = wmu_ref[...] + sigma_w * weps_ref[...].astype(jnp.float32)  # (tn, tk)

    # Contract over In for BOTH operands: x (tm, tk) . w (tn, tk) -> (tm, tn).
    # (W fed to the MXU in native (Out, In) layout; no in-kernel transpose.)
    acc_ref[...] += jax.lax.dot_general(
        x_ref[...], w_tile,
        dimension_numbers=(((1,), (1,)), ((), ())),
        preferred_element_type=jnp.float32)

    @pl.when(k == pl.num_programs(2) - 1)
    def _finalize():
        o_ref[...] = (acc_ref[...] + b_ref[...]).astype(o_ref.dtype)


def _pick_weight_tile(dim, target):
    """128-multiple tile <= target that divides the 128-aligned dim.

    Guarantees padding of the weight-sized streams is limited to the mandatory
    (8,128) alignment — no extra tile-level padded HBM copies.
    """
    dim_pad = _round_up(dim, 128)
    t = min(_round_up(target, 128), dim_pad)
    while dim_pad % t != 0:
        t -= 128
    return t, dim_pad


def prob_linear_matmul(x, w_mu, w_rho, eps_w, b_mu, b_rho, eps_b,
                       *, tm_target=256, tn_target=512, tk_target=1024):
    """x: (B, In); w_*: (Out, In); b_*: (Out,) -> (B, Out)."""
    B, In = x.shape
    Out = w_mu.shape[0]

    # Bias sample in plain jnp (only Out elements; fused into the epilogue).
    b_sample = (b_mu + _softplus(b_rho) * eps_b).reshape(1, Out).astype(jnp.float32)

    tn, Out_pad = _pick_weight_tile(Out, tn_target)
    tk, In_pad = _pick_weight_tile(In, tk_target)
    tm = min(_round_up(B, 8), tm_target)
    B_pad = _round_up(B, tm)

    # eps carries only sampling noise -> ship as bf16 (upcast in-kernel).
    eps_w = eps_w.astype(jnp.bfloat16)

    def pad2(a, r, c):
        return a if (r == 0 and c == 0) else jnp.pad(a, ((0, r), (0, c)))

    pad_b, pad_o, pad_i = B_pad - B, Out_pad - Out, In_pad - In
    x_p = pad2(x, pad_b, pad_i)
    wmu_p = pad2(w_mu, pad_o, pad_i)            # pad = 0
    wrho_p = pad2(w_rho, pad_o, pad_i)
    weps_p = pad2(eps_w, pad_o, pad_i)          # eps pad = 0 -> W pad = 0
    b_p = pad2(b_sample, 0, pad_o)

    grid = (B_pad // tm, Out_pad // tn, In_pad // tk)

    out = pl.pallas_call(
        _fused_linear_kernel,
        out_shape=jax.ShapeDtypeStruct((B_pad, Out_pad), x.dtype),
        grid_spec=pltpu.PrefetchScalarGridSpec(
            num_scalar_prefetch=0,
            grid=grid,
            in_specs=[
                pl.BlockSpec((tm, tk), lambda i, j, k: (i, k)),   # x
                pl.BlockSpec((tn, tk), lambda i, j, k: (j, k)),   # w_mu
                pl.BlockSpec((tn, tk), lambda i, j, k: (j, k)),   # w_rho
                pl.BlockSpec((tn, tk), lambda i, j, k: (j, k)),   # eps_w (bf16)
                pl.BlockSpec((1, tn), lambda i, j, k: (0, j)),    # b_sample
            ],
            out_specs=pl.BlockSpec((tm, tn), lambda i, j, k: (i, j)),
            scratch_shapes=[pltpu.VMEM((tm, tn), jnp.float32)],
        ),
        compiler_params=pltpu.CompilerParams(
            dimension_semantics=("parallel", "parallel", "arbitrary"),
            # ~14 MiB working set at the default tiles; 48 MiB leaves headroom
            # for larger tiles while staying safely under v7x's 64 MiB VMEM.
            vmem_limit_bytes=48 << 20),
    )(x_p, wmu_p, wrho_p, weps_p, b_p)

    return out[:B, :Out]


# ----------------------------------------------------------------------------
# Kernel 2: Gaussian KL divergence (tiled elementwise + reduction)
#   KL = 0.5 * sum( 2*(log sig_p - log sig_q)
#                   + ((mu_q - mu_p)^2 + sig_q^2) / sig_p^2 - 1 )
# Per-step: VPU-only accumulation into an (8, cols) scratch; XLU reduce once.
# Leading size-2 parallel axis -> per-core partials (v7x dual TensorCore).
# ----------------------------------------------------------------------------
def _kl_kernel(mu_q_ref, rho_q_ref, mu_p_ref, rho_p_ref, out_ref, acc_ref,
               *, rows, cols, tile_rows, tiles_per_core):
    c = pl.program_id(0)
    r = pl.program_id(1)

    @pl.when(r == 0)
    def _init():
        acc_ref[...] = jnp.zeros_like(acc_ref)

    sig_q = _softplus(rho_q_ref[...])
    sig_p = _softplus(rho_p_ref[...])
    b1 = sig_q * sig_q
    b0 = sig_p * sig_p
    inv_b0 = 1.0 / b0                                        # one reciprocal, reused
    term1 = 2.0 * (_log_softplus(rho_p_ref[...], sig_p)
                   - _log_softplus(rho_q_ref[...], sig_q))   # == log(b0/b1)
    diff = mu_q_ref[...] - mu_p_ref[...]
    val = term1 + (diff * diff + b1) * inv_b0 - 1.0

    # Mask padded rows/cols so padding never contributes to the sum.
    row0 = (c * tiles_per_core + r) * tile_rows
    row = row0 + jax.lax.broadcasted_iota(jnp.int32, val.shape, 0)
    col = jax.lax.broadcasted_iota(jnp.int32, val.shape, 1)
    val = jnp.where((row < rows) & (col < cols), val, 0.0)

    # VPU-only partial reduce: fold sublane groups of 8 rows onto the scratch.
    tr, cp = val.shape
    acc_ref[...] += jnp.sum(val.reshape(tr // 8, 8, cp), axis=0)

    @pl.when(r == pl.num_programs(1) - 1)
    def _finalize():
        out_ref[...] = 0.5 * jnp.sum(acc_ref[...], keepdims=True)


def gaussian_kl(mu_q, rho_q, mu_p, rho_p, *, tile_rows=None, vmem_budget=24 << 20):
    """All args 2-D float32 of identical shape; returns scalar KL(q || p)."""
    rows, cols = mu_q.shape
    cols_pad = _round_up(cols, 128)

    # 4 input streams x double buffer must stay under the budget (v7x-safe).
    if tile_rows is None:
        tile_rows = (vmem_budget // (4 * cols_pad * 4 * 2)) // 8 * 8
    tr = max(8, min(128, tile_rows, _round_up(rows, 8)))

    tiles = _cdiv(rows, tr)
    num_cores = 2 if tiles >= 2 else 1        # split rows across v7x's 2 TCs
    tiles_per_core = _cdiv(tiles, num_cores)
    rows_pad = num_cores * tiles_per_core * tr

    def pad(a):
        pr, pc = rows_pad - rows, cols_pad - cols
        return a if (pr == 0 and pc == 0) else jnp.pad(a, ((0, pr), (0, pc)))

    args = [pad(a) for a in (mu_q, rho_q, mu_p, rho_p)]
    spec = pl.BlockSpec((tr, cols_pad), lambda c, r: (c * tiles_per_core + r, 0))
    kernel = functools.partial(_kl_kernel, rows=rows, cols=cols,
                               tile_rows=tr, tiles_per_core=tiles_per_core)

    partials = pl.pallas_call(
        kernel,
        out_shape=jax.ShapeDtypeStruct((num_cores, 1), jnp.float32),
        grid_spec=pltpu.PrefetchScalarGridSpec(
            num_scalar_prefetch=0,
            grid=(num_cores, tiles_per_core),
            in_specs=[spec, spec, spec, spec],
            out_specs=pl.BlockSpec((1, 1), lambda c, r: (c, 0)),
            scratch_shapes=[pltpu.VMEM((8, cols_pad), jnp.float32)],
        ),
        compiler_params=pltpu.CompilerParams(
            dimension_semantics=("parallel", "arbitrary")),
    )(*args)
    return jnp.sum(partials)


def _gaussian_kl_jnp(mu_q, rho_q, mu_p, rho_p):
    """Plain-jnp KL for tiny (bias-sized) Gaussians — not worth a kernel."""
    sig_q = _softplus(rho_q)
    sig_p = _softplus(rho_p)
    b1 = sig_q * sig_q
    b0 = sig_p * sig_p
    term1 = 2.0 * (_log_softplus(rho_p, sig_p) - _log_softplus(rho_q, sig_q))
    d = mu_q - mu_p
    return 0.5 * jnp.sum(term1 + (d * d + b1) / b0 - 1.0)


# ----------------------------------------------------------------------------
# ProbLinear forward (sample mode): layer.sample(); y = layer(x)
# ----------------------------------------------------------------------------
def prob_linear_forward(x, params, eps_w, eps_b, training=True):
    w_mu, w_rho, b_mu, b_rho, wp_mu, wp_rho, bp_mu, bp_rho = params

    # Fused sample + matmul + bias-add (single pallas_call, hot path).
    y = prob_linear_matmul(x, w_mu, w_rho, eps_w, b_mu, b_rho, eps_b)

    kl = jnp.float32(0.0)
    if training:
        kl_w = gaussian_kl(w_mu, w_rho, wp_mu, wp_rho)
        kl_b = _gaussian_kl_jnp(b_mu, b_rho, bp_mu, bp_rho)
        kl = kl_w + kl_b
    return y, kl


# ----------------------------------------------------------------------------
# Deterministic parameter construction (mimics nn.Linear init + ProbLinear.__init__)
# ----------------------------------------------------------------------------
def make_params(key, in_features, out_features, rho_prior):
    kw, kb = jax.random.split(key)
    bound = 1.0 / math.sqrt(in_features)
    w_mu = jax.random.uniform(kw, (out_features, in_features), jnp.float32,
                              minval=-bound, maxval=bound)
    b_mu = jax.random.uniform(kb, (out_features,), jnp.float32,
                              minval=-bound, maxval=bound)
    w_rho = jnp.full_like(w_mu, rho_prior)
    b_rho = jnp.full_like(b_mu, rho_prior)
    # Posterior and prior are initialized identically (prior is fixed).
    return (w_mu, w_rho, b_mu, b_rho,
            w_mu, w_rho, b_mu, b_rho)


if __name__ == "__main__":
    rho_prior = math.log(math.expm1(0.03))   # typical PBB init: sigma_prior = 0.03
    key = jax.random.PRNGKey(0)

    # --- Test 1: small layer, posterior == prior (KL must be ~0) -------------
    B, IN, OUT = 8, 32, 16
    k_param, k_x, k_ew, k_eb, k2 = jax.random.split(key, 5)
    params = make_params(k_param, IN, OUT, rho_prior)
    x = jax.random.normal(k_x, (B, IN), jnp.float32)
    eps_w = jax.random.normal(k_ew, (OUT, IN), jnp.float32)
    eps_b = jax.random.normal(k_eb, (OUT,), jnp.float32)

    y, kl = prob_linear_forward(x, params, eps_w, eps_b, training=True)
    jax.block_until_ready((y, kl))

    w_mu, w_rho, b_mu, b_rho = params[:4]
    eps_w_q = eps_w.astype(jnp.bfloat16).astype(jnp.float32)   # kernel ships eps as bf16
    w_ref = w_mu + jnp.log1p(jnp.exp(w_rho)) * eps_w_q
    b_ref = b_mu + jnp.log1p(jnp.exp(b_rho)) * eps_b
    y_ref = x @ w_ref.T + b_ref
    assert y.shape == (B, OUT)
    assert jnp.allclose(y, y_ref, atol=1e-4, rtol=1e-5), "matmul mismatch vs reference"
    assert abs(float(kl)) < 1e-3, f"KL(q||p) should be ~0 at init, got {float(kl)}"

    # --- Test 2: multi-tile grid (k-accumulation), distinct prior, KL check --
    B2, IN2, OUT2 = 12, 384, 256
    ka, kb_, kc, kd, ke, kf = jax.random.split(k2, 6)
    bound2 = 1.0 / math.sqrt(IN2)
    w_mu2 = jax.random.uniform(ka, (OUT2, IN2), jnp.float32, minval=-bound2, maxval=bound2)
    b_mu2 = jax.random.uniform(kb_, (OUT2,), jnp.float32, minval=-bound2, maxval=bound2)
    w_rho2 = jnp.full((OUT2, IN2), rho_prior, jnp.float32)
    b_rho2 = jnp.full((OUT2,), rho_prior, jnp.float32)
    wp_mu2 = w_mu2 + 0.05 * jax.random.normal(kc, (OUT2, IN2), jnp.float32)
    wp_rho2 = jnp.full((OUT2, IN2), math.log(math.expm1(0.05)), jnp.float32)
    x2 = jax.random.normal(kd, (B2, IN2), jnp.float32)
    eps_w2 = jax.random.normal(ke, (OUT2, IN2), jnp.float32)
    eps_b2 = jax.random.normal(kf, (OUT2,), jnp.float32)

    # Small tile targets to exercise the (i, j, k) grid and per-j bias blocks.
    y2 = prob_linear_matmul(x2, w_mu2, w_rho2, eps_w2, b_mu2, b_rho2, eps_b2,
                            tn_target=128, tk_target=128)
    # Small tile_rows to exercise the 2-core / multi-tile KL path.
    kl_w2 = gaussian_kl(w_mu2, w_rho2, wp_mu2, wp_rho2, tile_rows=64)
    jax.block_until_ready((y2, kl_w2))

    eps_w2_q = eps_w2.astype(jnp.bfloat16).astype(jnp.float32)
    w2_ref = w_mu2 + jnp.log1p(jnp.exp(w_rho2)) * eps_w2_q
    b2_ref = b_mu2 + jnp.log1p(jnp.exp(b_rho2)) * eps_b2
    y2_ref = x2 @ w2_ref.T + b2_ref
    assert jnp.allclose(y2, y2_ref, atol=1e-4, rtol=1e-5), "matmul-2 mismatch vs reference"

    sq = jnp.log1p(jnp.exp(w_rho2)); sp_ = jnp.log1p(jnp.exp(wp_rho2))
    b1 = sq * sq; b0 = sp_ * sp_
    kl_ref = 0.5 * jnp.sum(jnp.log(b0 / b1) + (w_mu2 - wp_mu2) ** 2 / b0 + b1 / b0 - 1.0)
    assert jnp.allclose(kl_w2, kl_ref, rtol=1e-3), f"KL mismatch: {kl_w2} vs {kl_ref}"

    print("KERNEL_OK")
</pallas_src>

<mosaic_0001>
module attributes {stable_mosaic.version = 11 : i64} {
  func.func @_fused_linear_kernel(%arg0: i32, %arg1: i32, %arg2: i32, %arg3: memref<8x128xf32, #tpu.memory_space<vmem>>, %arg4: memref<128x128xf32, #tpu.memory_space<vmem>>, %arg5: memref<128x128xf32, #tpu.memory_space<vmem>>, %arg6: memref<128x128xbf16, #tpu.memory_space<vmem>>, %arg7: memref<1x128xf32, #tpu.memory_space<vmem>>, %arg8: memref<8x128xf32, #tpu.memory_space<vmem>>, %arg9: memref<8x128xf32, #tpu.memory_space<vmem>>) attributes {dimension_semantics = [#tpu.dimension_semantics<parallel>, #tpu.dimension_semantics<parallel>, #tpu.dimension_semantics<arbitrary>], iteration_bounds = array<i64: 1, 1, 1>, scalar_prefetch = 0 : i64, scratch_operands = 1 : i64, tpu.core_type = #tpu.core_type<tc>, window_params = [{transform_indices = @transform_0, window_bounds = array<i64: 8, 128>}, {transform_indices = @transform_1, window_bounds = array<i64: 128, 128>}, {transform_indices = @transform_2, window_bounds = array<i64: 128, 128>}, {transform_indices = @transform_3, window_bounds = array<i64: 128, 128>}, {transform_indices = @transform_4, window_bounds = array<i64: 1, 128>}, {transform_indices = @transform_5, window_bounds = array<i64: 8, 128>}]} {
    %c0_i32 = arith.constant 0 : i32
    %0 = arith.cmpi eq, %arg2, %c0_i32 : i32
    %1 = arith.extui %0 : i1 to i32
    %c0_i32_0 = arith.constant 0 : i32
    %2 = arith.cmpi ne, %1, %c0_i32_0 : i32
    scf.if %2 {
      %cst_16 = arith.constant 0.000000e+00 : f32
      %25 = vector.broadcast %cst_16 : f32 to vector<8x128xf32>
      %c0_17 = arith.constant 0 : index
      %c0_18 = arith.constant 0 : index
      %26 = vector.load %arg9[%c0_17, %c0_18] : memref<8x128xf32, #tpu.memory_space<vmem>>, vector<8x128xf32>
      tpu.vector_store %arg9[%c0_17, %c0_18], %25 {strides = array<i32>} : memref<8x128xf32, #tpu.memory_space<vmem>>, vector<8x128xf32>,
    } else {
    }
    %c0 = arith.constant 0 : index
    %c0_1 = arith.constant 0 : index
    %3 = vector.load %arg5[%c0, %c0_1] : memref<128x128xf32, #tpu.memory_space<vmem>>, vector<128x128xf32>
    %cst = arith.constant 0.000000e+00 : f32
    %4 = vector.broadcast %cst : f32 to vector<128x128xf32>
    %5 = arith.maximumf %3, %4 : vector<128x128xf32>
    %6 = math.absf %3 : vector<128x128xf32>
    %cst_2 = arith.constant 0.000000e+00 : f32
    %7 = vector.broadcast %cst_2 : f32 to vector<128x128xf32>
    %8 = arith.subf %7, %6 : vector<128x128xf32>
    %9 = math.exp %8 : vector<128x128xf32>
    %10 = math.log1p %9 : vector<128x128xf32>
    %11 = arith.addf %5, %10 : vector<128x128xf32>
    %c0_3 = arith.constant 0 : index
    %c0_4 = arith.constant 0 : index
    %12 = vector.load %arg4[%c0_3, %c0_4] : memref<128x128xf32, #tpu.memory_space<vmem>>, vector<128x128xf32>
    %c0_5 = arith.constant 0 : index
    %c0_6 = arith.constant 0 : index
    %13 = vector.load %arg6[%c0_5, %c0_6] : memref<128x128xbf16, #tpu.memory_space<vmem>>, vector<128x128xbf16>
    %14 = arith.extf %13 : vector<128x128xbf16> to vector<128x128xf32>
    %15 = arith.mulf %11, %14 : vector<128x128xf32>
    %16 = arith.addf %12, %15 : vector<128x128xf32>
    %c0_7 = arith.constant 0 : index
    %c0_8 = arith.constant 0 : index
    %17 = vector.load %arg9[%c0_7, %c0_8] : memref<8x128xf32, #tpu.memory_space<vmem>>, vector<8x128xf32>
    %c0_9 = arith.constant 0 : index
    %c0_10 = arith.constant 0 : index
    %18 = vector.load %arg3[%c0_9, %c0_10] : memref<8x128xf32, #tpu.memory_space<vmem>>, vector<8x128xf32>
    %cst_11 = arith.constant dense<0.000000e+00> : vector<8x128xf32>
    %19 = tpu.matmul %18, %16, %cst_11 {dimension_numbers = #tpu.dot_dimension_numbers<[1], [1], [0], [0], [0, 0, 1, 0], [], []>} : vector<8x128xf32>, vector<128x128xf32>, vector<8x128xf32> -> vector<8x128xf32>
    %20 = arith.addf %17, %19 : vector<8x128xf32>
    %c0_12 = arith.constant 0 : index
    %c0_13 = arith.constant 0 : index
    %21 = vector.load %arg9[%c0_12, %c0_13] : memref<8x128xf32, #tpu.memory_space<vmem>>, vector<8x128xf32>
    tpu.vector_store %arg9[%c0_12, %c0_13], %20 {strides = array<i32>} : memref<8x128xf32, #tpu.memory_space<vmem>>, vector<8x128xf32>,
    %c0_i32_14 = arith.constant 0 : i32
    %22 = arith.cmpi eq, %arg2, %c0_i32_14 : i32
    %23 = arith.extui %22 : i1 to i32
    %c0_i32_15 = arith.constant 0 : i32
    %24 = arith.cmpi ne, %23, %c0_i32_15 : i32
    scf.if %24 {
      %c0_16 = arith.constant 0 : index
      %c0_17 = arith.constant 0 : index
      %25 = vector.load %arg9[%c0_16, %c0_17] : memref<8x128xf32, #tpu.memory_space<vmem>>, vector<8x128xf32>
      %c0_18 = arith.constant 0 : index
      %c0_19 = arith.constant 0 : index
      %26 = vector.load %arg7[%c0_18, %c0_19] : memref<1x128xf32, #tpu.memory_space<vmem>>, vector<1x128xf32>
      %27 = vector.broadcast %26 : vector<1x128xf32> to vector<8x128xf32>
      %28 = arith.addf %25, %27 : vector<8x128xf32>
      %c0_20 = arith.constant 0 : index
      %c0_21 = arith.constant 0 : index
      %29 = vector.load %arg8[%c0_20, %c0_21] : memref<8x128xf32, #tpu.memory_space<vmem>>, vector<8x128xf32>
      tpu.vector_store %arg8[%c0_20, %c0_21], %28 {strides = array<i32>} : memref<8x128xf32, #tpu.memory_space<vmem>>, vector<8x128xf32>,
    } else {
    }
    return
  }
  func.func @transform_0(%arg0: i32, %arg1: i32, %arg2: i32) -> (i32, i32) {
    %c0_i32 = arith.constant 0 : i32
    return %arg0, %arg2 : i32, i32
  }
  func.func @transform_1(%arg0: i32, %arg1: i32, %arg2: i32) -> (i32, i32) {
    %c0_i32 = arith.constant 0 : i32
    return %arg1, %arg2 : i32, i32
  }
  func.func @transform_2(%arg0: i32, %arg1: i32, %arg2: i32) -> (i32, i32) {
    %c0_i32 = arith.constant 0 : i32
    return %arg1, %arg2 : i32, i32
  }
  func.func @transform_3(%arg0: i32, %arg1: i32, %arg2: i32) -> (i32, i32) {
    %c0_i32 = arith.constant 0 : i32
    return %arg1, %arg2 : i32, i32
  }
  func.func @transform_4(%arg0: i32, %arg1: i32, %arg2: i32) -> (i32, i32) {
    %c0_i32 = arith.constant 0 : i32
    %c0_i32_0 = arith.constant 0 : i32
    return %c0_i32, %arg1 : i32, i32
  }
  func.func @transform_5(%arg0: i32, %arg1: i32, %arg2: i32) -> (i32, i32) {
    %c0_i32 = arith.constant 0 : i32
    return %arg0, %arg1 : i32, i32
  }
}

</mosaic_0001>

<bundles_post_ra>
// kernel: tpu_custom_call.1
= control target key start
LH: loop header
LB: loop body
LE: loop exit
PB: predicated region body
PF: predicated region fallthrough
CT: control target
= control target key end

     0   :  { %10 = vsyncpa [#allocation4], 0  ;;  %s985_s0 = inlined_call_operand.hbm [shape: f32[8,128], index: 0, kind: input, shape index: {}]   ;;  %s986_s1 = inlined_call_operand.hbm [shape: f32[128,128], index: 1, kind: input, shape index: {}]   ;;  %s987_s2 = inlined_call_operand.hbm [shape: f32[128,128], index: 2, kind: input, shape index: {}]   ;;  %s988_s3 = inlined_call_operand.hbm [shape: bf16[128,128], index: 3, kind: input, shape index: {}]   ;;  %s989_s4 = inlined_call_operand.vmem [shape: f32[1,128], index: 4, kind: input, shape index: {}]   ;;  %s990_s5 = inlined_call_operand.hbm [shape: f32[8,128], index: 5, kind: output, shape index: {}]  }
   0x1   :  { %11 = vsyncpa [#allocation7], 0 }
   0x2   :  { %12 = vsyncpa [#allocation10], 0  ;;  %s29_s20 = sshll.u32 %s986_s1, 4  ;;  %s30_s20 = int_to_ptr.hbm [resolvable:$true] %s29_s20 }
   0x3   :  { %13 = vsyncpa [#allocation5], 0  ;;  %s717_s21 = smov [#allocation6]   ;;  %s19_s25 = sshll.u32 %s985_s0, 4  ;;  %s20_s25 = int_to_ptr.hbm [resolvable:$true] %s19_s25 }
   0x4   :  { %s31_s22 = sshll.u32 %s717_s21, 4  ;;  %s718_s26 = smov 128   ;;  %s32_s22 = int_to_ptr.vmem [resolvable:$true] %s31_s22 }
   0x5   :  { %s719_s27 = smov 8   ;;  %s720_s28 = smov [#allocation3]  }
   0x6   :  { %37 = dma.hbm_to_vmem [thread:$0]  %s30_s20, 2048, %s32_s22, [#allocation7], %s718_s26, %s718_s26, %s719_s27  }
   0x7   :  { %s21_s29 = sshll.u32 %s720_s28, 4  ;;  %s42_s7 = sshll.u32 %s987_s2, 4  ;;  %s22_s29 = int_to_ptr.vmem [resolvable:$true] %s21_s29  ;;  %s43_s7 = int_to_ptr.hbm [resolvable:$true] %s42_s7 }
   0x8   :  { %24 = dma.hbm_to_vmem [thread:$0]  %s20_s25, 128, %s22_s29, [#allocation4]  }
   0x9   :  { %s55_s9 = sshll.u32 %s988_s3, 4  ;;  %s721_s10 = smov [#allocation8]   ;;  %s56_s9 = int_to_ptr.hbm [resolvable:$true] %s55_s9 }
   0xa   :  { %s44_s11 = sshll.u32 %s721_s10, 4  ;;  %s722_s0 = smov [#allocation9]   ;;  %s45_s11 = int_to_ptr.vmem [resolvable:$true] %s44_s11 }
   0xb   :  { %50 = dma.hbm_to_vmem [thread:$0]  %s43_s7, 2048, %s45_s11, [#allocation7], %s718_s26, %s718_s26, %s719_s27  }
   0xc   :  { %s57_s12 = sshll.u32 %s722_s0, 4  ;;  %s723_s13 = smov 64   ;;  %s58_s12 = int_to_ptr.vmem [resolvable:$true] %s57_s12 }
   0xd   :  { %s724_s14 = smov 4  }
   0xe   :  { %63 = dma.hbm_to_vmem [thread:$0]  %s56_s9, 1024, %s58_s12, [#allocation10], %s723_s13, %s723_s13, %s724_s14  }
   0xf   :  { %709 = dma.done.wait [#allocation4], 128  }
  0x10   :  { %710 = vsyncadd [#allocation4], 4294967168 }
  0x11   :  { %711 = dma.done.wait [#allocation7], 4096  }
  0x12   :  { %712 = vsyncadd [#allocation7], 4294963200 }
  0x13   :  { %713 = dma.done.wait [#allocation10], 1024  }
  0x14   :  { %714 = vsyncadd [#allocation10], 4294966272  ;;  %v768_v0 = vld [vmem:[#allocation8 + $0x78] sm:$0xff]  ;;  %v771_v2 = vld [vmem:[#allocation8 + $0x70] sm:$0xff]  ;;  %s725_s15 = smov [#allocation11]   ;;  %s464_s19 = sshll.u32 %s990_s5, 4  ;;  %s465_s19 = int_to_ptr.hbm [resolvable:$true] %s464_s19 }
  0x15   :  { %v134_v1 = vand.u32 2147483647, %v768_v0  ;;  %v773_v3 = vld [vmem:[#allocation8 + $0x68] sm:$0xff]  ;;  %v133_v4 = vand.u32 2147483647, %v771_v2  ;;  %v777_v7 = vld [vmem:[#allocation8 + $0x60] sm:$0xff] }
  0x16   :  { %v132_v5 = vand.u32 2147483647, %v773_v3  ;;  %v779_v8 = vld [vmem:[#allocation8 + $0x58] sm:$0xff]  ;;  %v781_v11 = vld [vmem:[#allocation8 + $0x50] sm:$0xff]  ;;  %v783_v12 = vld [vmem:[#allocation8 + $0x48] sm:$0xff]  ;;  %v118_v30 = vmax.f32 %v768_v0, 0.0 }
  0x17   :  { %v150_v6 = vsub.f32 0.0, %v134_v1  ;;  %v149_v9 = vsub.f32 0.0, %v133_v4  ;;  %v131_v14 = vand.u32 2147483647, %v777_v7  ;;  %v130_v15 = vand.u32 2147483647, %v779_v8 }
  0x18   :  { %v148_v10 = vsub.f32 0.0, %v132_v5  ;;  %v129_v18 = vand.u32 2147483647, %v781_v11  ;;  %v788_v19 = vld [vmem:[#allocation9 + $0x38] sm:$0xff]   ;;  %v128_v22 = vand.u32 2147483647, %v783_v12 }
  0x19   :  { %v181_v13 = vmul.f32 1.442695, %v150_v6  ;;  %v179_v16 = vmul.f32 1.442695, %v149_v9  ;;  %v147_v20 = vsub.f32 0.0, %v131_v14  ;;  %v146_v21 = vsub.f32 0.0, %v130_v15 }
  0x1a   :  { %v177_v17 = vmul.f32 1.442695, %v148_v10  ;;  %v791_v23 = vld [vmem:[#allocation8 + $0x40] sm:$0xff]  ;;  %v145_v24 = vsub.f32 0.0, %v129_v18  ;;  %v794_v26 = vld [vmem:[#allocation9 + $0x30] sm:$0xff]   ;;  %v144_v29 = vsub.f32 0.0, %v128_v22  ;;  %v507_v31 = vunpack.c.h.bf16 %v788_v19 }
  0x1b   :  { %525 = vpow2.f32 %v181_v13  ;;  %v127_v25 = vand.u32 2147483647, %v791_v23  ;;  %v175_v27 = vmul.f32 1.442695, %v147_v20  ;;  %v173_v28 = vmul.f32 1.442695, %v146_v21 }
  0x1c   :  { %527 = vpow2.f32 %v179_v16  ;;  %v171_v32 = vmul.f32 1.442695, %v145_v24  ;;  %v117_v33 = vmax.f32 %v771_v2, 0.0  ;;  %v506_v34 = vunpack.c.l.bf16 %v788_v19  ;;  %v800_v36 = vld [vmem:[#allocation8 + $0x38] sm:$0xff]  ;;  %v805_v40 = vld [vmem:[#allocation8 + $0x30] sm:$0xff]  ;;  %v809_v45 = vld [vmem:[#allocation8 + $0x28] sm:$0xff] }
  0x1d   :  { %529 = vpow2.f32 %v177_v17  ;;  %v169_v35 = vmul.f32 1.442695, %v144_v29  ;;  %v116_v37 = vmax.f32 %v773_v3, 0.0  ;;  %v503_v38 = vunpack.c.h.bf16 %v794_v26  ;;  %v357_v14 = vld [vmem:[#allocation6 + $0x70] sm:$0xff]  ;;  %s462_s16 = sshll.u32 %s725_s15, 4  ;;  %s463_s16 = int_to_ptr.vmem [resolvable:$true] %s462_s16 }
  0x1e   :  { %531 = vpow2.f32 %v175_v27  ;;  %v115_v39 = vmax.f32 %v777_v7, 0.0  ;;  %v502_v42 = vunpack.c.l.bf16 %v794_v26  ;;  %v114_v43 = vmax.f32 %v779_v8, 0.0  ;;  %v356_v7 = vld [vmem:[#allocation6 + $0x68] sm:$0xff] }
  0x1f   :  { %533 = vpow2.f32 %v173_v28  ;;  %v143_v44 = vsub.f32 0.0, %v127_v25  ;;  %v126_v50 = vand.u32 2147483647, %v800_v36  ;;  %v125_v54 = vand.u32 2147483647, %v805_v40 }
  0x20   :  { %535 = vpow2.f32 %v171_v32  ;;  %v124_v57 = vand.u32 2147483647, %v809_v45  ;;  %v112_v8 = vmax.f32 %v783_v12, 0.0  ;;  %v111_v26 = vmax.f32 %v791_v23, 0.0 }
  0x21   :  { %v526_v41 = vpop.eup %525  ;;  %537 = vpow2.f32 %v169_v35  ;;  %v818_v4 = vmul.f32 1.442695, %v143_v44 }
  0x22   :  { %v528_v46 = vpop.eup %527  ;;  %v318_v47 = vadd.f32 1.0, %v526_v41  ;;  %v321_v48 = vmul.f32 -0.5, %v526_v41  ;;  %v324_v49 = vand.u32 2147483647, %v526_v41 }
  0x23   :  { %v530_v51 = vpop.eup %529  ;;  %v309_v52 = vadd.f32 1.0, %v528_v46  ;;  %v312_v53 = vmul.f32 -0.5, %v528_v46  ;;  %v315_v55 = vand.u32 2147483647, %v528_v46 }
  0x24   :  { %539 = vlog2.f32 %v318_v47  ;;  %v300_v56 = vadd.f32 1.0, %v530_v51  ;;  %v532_v58 = vpop.eup %531  ;;  %v322_v59 = vadd.f32 1.0, %v321_v48  ;;  %v303_v61 = vmul.f32 -0.5, %v530_v51 }
  0x25   :  { %541 = vlog2.f32 %v309_v52  ;;  %v313_v60 = vadd.f32 1.0, %v312_v53  ;;  %v534_v62 = vpop.eup %533  ;;  %vm814_vm0 = vcmp.lt.f32.partialorder %v324_v49, 0.0004427343  ;;  %v291_v1 = vadd.f32 1.0, %v532_v58 }
  0x26   :  { %543 = vlog2.f32 %v300_v56  ;;  %v536_v5 = vpop.eup %535  ;;  %v304_v6 = vadd.f32 1.0, %v303_v61  ;;  %v306_v9 = vand.u32 2147483647, %v530_v51  ;;  %v294_v10 = vmul.f32 -0.5, %v532_v58 }
  0x27   :  { %v297_v13 = vand.u32 2147483647, %v532_v58  ;;  %vm820_vm1 = vcmp.lt.f32.partialorder %v315_v55, 0.0004427343  ;;  %545 = vlog2.f32 %v291_v1  ;;  %v282_v15 = vadd.f32 1.0, %v534_v62  ;;  %v824_v17 = vpop.eup %537  ;;  %v358_v1 = vld [vmem:[#allocation6 + $0x78] sm:$0xff] }
  0x28   :  { %v285_v16 = vmul.f32 -0.5, %v534_v62  ;;  %v323_v18 = vmul.f32 %v526_v41, %v322_v59  ;;  %v314_v20 = vmul.f32 %v528_v46, %v313_v60  ;;  %v295_v21 = vadd.f32 1.0, %v294_v10 }
  0x29   :  { %v288_v22 = vand.u32 2147483647, %v534_v62  ;;  %547 = vlog2.f32 %v282_v15  ;;  %v273_v27 = vadd.f32 1.0, %v536_v5  ;;  %v276_v28 = vmul.f32 -0.5, %v536_v5 }
  0x2a   :  { %v540_v24 = vpop.eup %539  ;;  %v286_v25 = vadd.f32 1.0, %v285_v16  ;;  %v305_v35 = vmul.f32 %v530_v51, %v304_v6  ;;  %vm826_vm2 = vcmp.lt.f32.partialorder %v306_v9, 0.0004427343  ;;  %vm830_vm3 = vcmp.lt.f32.partialorder %v297_v13, 0.0004427343  ;;  %v512_v16 = vld [vmem:[#allocation9 + $0x28] sm:$0xff]  }
  0x2b   :  { %v542_v29 = vpop.eup %541  ;;  %v320_v32 = vmul.f32 0.6931472, %v540_v24  ;;  %v296_v48 = vmul.f32 %v532_v58, %v295_v21  ;;  %549 = vlog2.f32 %v273_v27  ;;  %v277_v49 = vadd.f32 1.0, %v276_v28  ;;  %v870_v24 = vld [vmem:[#allocation8 + $0x20] sm:$0xff] }
  0x2c   :  { %v544_v41 = vpop.eup %543  ;;  %v311_v46 = vmul.f32 0.6931472, %v542_v29  ;;  %vm836_vm4 = vcmp.lt.f32.partialorder %v288_v22, 0.0004427343  ;;  %v279_v51 = vand.u32 2147483647, %v536_v5  ;;  %v287_v61 = vmul.f32 %v534_v62, %v286_v25 }
  0x2d   :  { %v326_v52 = vsel %vm814_vm0, %v323_v18, %v320_v32  ;;  %v302_v53 = vmul.f32 0.6931472, %v544_v41  ;;  %v546_v56 = vpop.eup %545  ;;  %v264_v58 = vadd.f32 1.0, %v824_v17  ;;  %v267_v10 = vmul.f32 -0.5, %v824_v17 }
  0x2e   :  { %v342_v59 = vadd.f32 %v326_v52, %v118_v30  ;;  %v317_v60 = vsel %vm820_vm1, %v314_v20, %v311_v46  ;;  %v293_v9 = vmul.f32 0.6931472, %v546_v56  ;;  %v278_v62 = vmul.f32 %v536_v5, %v277_v49  ;;  %v901_v56 = vld [vmem:[#allocation8 + $0x18] sm:$0xff] }
  0x2f   :  { %v341_v63 = vadd.f32 %v317_v60, %v117_v33  ;;  %v308_v6 = vsel %vm826_vm2, %v305_v35, %v302_v53  ;;  %v548_v13 = vpop.eup %547  ;;  %551 = vlog2.f32 %v264_v58  ;;  %v268_v18 = vadd.f32 1.0, %v267_v10  ;;  %v354_v60 = vld [vmem:[#allocation6 + $0x58] sm:$0xff] }
  0x30   :  { %v406_v0 = vmul.f32 %v507_v31, %v342_v59  ;;  %v340_v30 = vadd.f32 %v308_v6, %v116_v37  ;;  %v299_v33 = vsel %vm830_vm3, %v296_v48, %v293_v9  ;;  %v284_v15 = vmul.f32 0.6931472, %v548_v13  ;;  %v355_v48 = vld [vmem:[#allocation6 + $0x60] sm:$0xff] }
  0x31   :  { %v405_v2 = vmul.f32 %v506_v34, %v341_v63  ;;  %v550_v20 = vpop.eup %549  ;;  %v113_v22 = vmax.f32 %v781_v11, 0.0  ;;  %vm859_vm5 = vcmp.lt.f32.partialorder %v279_v51, 0.0004427343  ;;  %v270_v3 = vand.u32 2147483647, %v824_v17  ;;  %v899_v51 = vld [vmem:[#allocation9 + $0x18] sm:$0xff]  }
  0x32   :  { %v422_v21 = vadd.f32 %v406_v0, %v358_v1  ;;  %v339_v19 = vadd.f32 %v299_v33, %v115_v39  ;;  %v290_v34 = vsel %vm836_vm4, %v287_v61, %v284_v15  ;;  %v275_v37 = vmul.f32 0.6931472, %v550_v20  ;;  %v353_v1 = vld [vmem:[#allocation6 + $0x50] sm:$0xff] }
  0x33   :  { %v142_v5 = vsub.f32 0.0, %v126_v50  ;;  %v421_v11 = vadd.f32 %v405_v2, %v357_v14  ;;  %v404_v25 = vmul.f32 %v503_v38, %v340_v30  ;;  %v499_v27 = vunpack.c.h.bf16 %v512_v16  ;;  %v908_v15 = vld [vmem:[#allocation8 + $0x10] sm:$0xff] }
  0x34   :  { %425 = vmatpush.xpose.msra.mxu0 %v422_v21  ;;  %v141_v28 = vsub.f32 0.0, %v125_v54  ;;  %v281_v39 = vsel %vm859_vm5, %v278_v62, %v275_v37  ;;  %v269_v29 = vmul.f32 %v824_v17, %v268_v18  ;;  %553 = vpow2.f32 %v818_v4  ;;  %v888_v54 = vld [vmem:[#allocation9 + $0x20] sm:$0xff]  }
  0x35   :  { %v140_v50 = vsub.f32 0.0, %v124_v57  ;;  %v552_v32 = vpop.eup %551  ;;  %v338_v35 = vadd.f32 %v290_v34, %v114_v43  ;;  %v498_v38 = vunpack.c.l.bf16 %v512_v16  ;;  %vm884_vm6 = vcmp.lt.f32.partialorder %v270_v3, 0.0004427343 }
  0x36   :  { %v123_v47 = vand.u32 2147483647, %v870_v24  ;;  %v403_v17 = vmul.f32 %v502_v42, %v339_v19  ;;  %v337_v4 = vadd.f32 %v281_v39, %v113_v22  ;;  %v266_v41 = vmul.f32 0.6931472, %v552_v32 }
  0x37   :  { %v165_v46 = vmul.f32 1.442695, %v142_v5  ;;  %v420_v57 = vadd.f32 %v404_v25, %v356_v7  ;;  %v163_v43 = vmul.f32 1.442695, %v141_v28  ;;  %v495_v52 = vunpack.c.h.bf16 %v888_v54 }
  0x38   :  { %426 = vmatpush.xpose.msra.mxu0 %v421_v11  ;;  %v272_v49 = vsel %vm884_vm6, %v269_v29, %v266_v41  ;;  %v161_v53 = vmul.f32 1.442695, %v140_v50  ;;  %v402_v55 = vmul.f32 %v499_v27, %v338_v35  ;;  %v494_v42 = vunpack.c.l.bf16 %v888_v54  ;;  %v912_v29 = vld [vmem:[#allocation9 + $0x10] sm:$0xff]   ;;  %v352_v50 = vld [vmem:[#allocation6 + $0x48] sm:$0xff] }
  0x39   :  { %555 = vpow2.f32 %v165_v46  ;;  %v419_v12 = vadd.f32 %v403_v17, %v355_v48  ;;  %v401_v61 = vmul.f32 %v498_v38, %v337_v4  ;;  %v139_v58 = vsub.f32 0.0, %v123_v47 }
  0x3a   :  { %557 = vpow2.f32 %v163_v43  ;;  %v554_v59 = vpop.eup %553  ;;  %v336_v63 = vadd.f32 %v272_v49, %v112_v8  ;;  %v110_v10 = vmax.f32 %v800_v36, 0.0  ;;  %v491_v13 = vunpack.c.h.bf16 %v899_v51 }
  0x3b   :  { %559 = vpow2.f32 %v161_v53  ;;  %v255_v6 = vadd.f32 1.0, %v554_v59  ;;  %v258_v9 = vmul.f32 -0.5, %v554_v59  ;;  %v109_v0 = vmax.f32 %v805_v40, 0.0 }
  0x3c   :  { %427 = vmatpush.xpose.msra.mxu0 %v420_v57  ;;  %v159_v30 = vmul.f32 1.442695, %v139_v58  ;;  %v122_v62 = vand.u32 2147483647, %v901_v56  ;;  %v418_v14 = vadd.f32 %v402_v55, %v354_v60  ;;  %v490_v33 = vunpack.c.l.bf16 %v899_v51  ;;  %v929_v60 = vld [vmem:[#allocation8 + $0x8] sm:$0xff] }
  0x3d   :  { %561 = vlog2.f32 %v255_v6  ;;  %v259_v2 = vadd.f32 1.0, %v258_v9  ;;  %v417_v18 = vadd.f32 %v401_v61, %v353_v1  ;;  %v108_v20 = vmax.f32 %v809_v45, 0.0  ;;  %v351_v9 = vld [vmem:[#allocation6 + $0x40] sm:$0xff] }
  0x3e   :  { %563 = vpow2.f32 %v159_v30  ;;  %v138_v21 = vsub.f32 0.0, %v122_v62  ;;  %v400_v31 = vmul.f32 %v495_v52, %v336_v63  ;;  %v261_v3 = vand.u32 2147483647, %v554_v59 }
  0x3f   :  { %v556_v16 = vpop.eup %555  ;;  %v121_v27 = vand.u32 2147483647, %v908_v15  ;;  %v260_v28 = vmul.f32 %v554_v59, %v259_v2  ;;  %v487_v48 = vunpack.c.h.bf16 %v912_v29  ;;  %v120_v23 = vand.u32 2147483647, %v929_v60 }
  0x40   :  { %v558_v22 = vpop.eup %557  ;;  %428 = vmatpush.xpose.msra.mxu0 %v419_v12  ;;  %v246_v19 = vadd.f32 1.0, %v556_v16  ;;  %v249_v34 = vmul.f32 -0.5, %v556_v16  ;;  %v157_v25 = vmul.f32 1.442695, %v138_v21  ;;  %v252_v7 = vand.u32 2147483647, %v556_v16 }
  0x41   :  { %v560_v37 = vpop.eup %559  ;;  %v237_v5 = vadd.f32 1.0, %v558_v22  ;;  %v240_v11 = vmul.f32 -0.5, %v558_v22  ;;  %v243_v35 = vand.u32 2147483647, %v558_v22  ;;  %vm914_vm7 = vcmp.lt.f32.partialorder %v261_v3, 0.0004427343 }
  0x42   :  { %565 = vlog2.f32 %v246_v19  ;;  %v228_v39 = vadd.f32 1.0, %v560_v37  ;;  %v250_v32 = vadd.f32 1.0, %v249_v34  ;;  %v231_v38 = vmul.f32 -0.5, %v560_v37 }
  0x43   :  { %567 = vlog2.f32 %v237_v5  ;;  %v562_v44 = vpop.eup %561  ;;  %v241_v17 = vadd.f32 1.0, %v240_v11  ;;  %v234_v4 = vand.u32 2147483647, %v560_v37  ;;  %v416_v8 = vadd.f32 %v400_v31, %v352_v50  ;;  %v350_v5 = vld [vmem:[#allocation6 + $0x38] sm:$0xff] }
  0x44   :  { %429 = vmatpush.xpose.msra.mxu0 %v418_v14  ;;  %569 = vlog2.f32 %v228_v39  ;;  %v564_v41 = vpop.eup %563  ;;  %v257_v46 = vmul.f32 0.6931472, %v562_v44  ;;  %v232_v57 = vadd.f32 1.0, %v231_v38  ;;  %vm919_vm8 = vcmp.lt.f32.partialorder %v252_v7, 0.0004427343 }
  0x45   :  { %571 = vpow2.f32 %v157_v25  ;;  %v219_v49 = vadd.f32 1.0, %v564_v41  ;;  %v222_v52 = vmul.f32 -0.5, %v564_v41  ;;  %v251_v55 = vmul.f32 %v556_v16, %v250_v32 }
  0x46   :  { %v263_v53 = vsel %vm914_vm7, %v260_v28, %v257_v46  ;;  %vm925_vm9 = vcmp.lt.f32.partialorder %v243_v35, 0.0004427343  ;;  %v137_v12 = vsub.f32 0.0, %v121_v27  ;;  %v242_v1 = vmul.f32 %v558_v22, %v241_v17  ;;  %v349_v17 = vld [vmem:[#allocation6 + $0x30] sm:$0xff] }
  0x47   :  { %v335_v58 = vadd.f32 %v263_v53, %v111_v26  ;;  %vm933_vm10 = vcmp.lt.f32.partialorder %v234_v4, 0.0004427343  ;;  %573 = vlog2.f32 %v219_v49  ;;  %v233_v62 = vmul.f32 %v560_v37, %v232_v57  ;;  %v348_v49 = vld [vmem:[#allocation6 + $0x28] sm:$0xff] }
  0x48   :  { %v566_v61 = vpop.eup %565  ;;  %430 = vmatpush.xpose.msra.mxu0 %v417_v18  ;;  %v223_v14 = vadd.f32 1.0, %v222_v52  ;;  %v155_v2 = vmul.f32 1.442695, %v137_v12  ;;  %v225_v31 = vand.u32 2147483647, %v564_v41  ;;  %v107_v19 = vmax.f32 %v870_v24, 0.0 }
  0x49   :  { %v568_v6 = vpop.eup %567  ;;  %v248_v30 = vmul.f32 0.6931472, %v566_v61  ;;  %v399_v21 = vmul.f32 %v494_v42, %v335_v58  ;;  %v951_v24 = vld [vmem:[#allocation8] sm:$0xff]  ;;  %v136_v39 = vsub.f32 0.0, %v120_v23  ;;  %v106_v45 = vmax.f32 %v901_v56, 0.0  ;;  %v508_v56 = vld [vmem:[#allocation9 + $0x8] sm:$0xff]  }
  0x4a   :  { %v570_v16 = vpop.eup %569  ;;  %v239_v18 = vmul.f32 0.6931472, %v568_v6  ;;  %575 = vpow2.f32 %v155_v2  ;;  %v224_v27 = vmul.f32 %v564_v41, %v223_v14  ;;  %vm955_vm11 = vcmp.lt.f32.partialorder %v225_v31, 0.0004427343 }
  0x4b   :  { %v572_v26 = vpop.eup %571  ;;  %v254_v22 = vsel %vm919_vm8, %v251_v55, %v248_v30  ;;  %v230_v3 = vmul.f32 0.6931472, %v570_v16  ;;  %v415_v34 = vadd.f32 %v399_v21, %v351_v9  ;;  %v153_v44 = vmul.f32 1.442695, %v136_v39 }
  0x4c   :  { %431 = vmatpush.xpose.msra.mxu0 %v416_v8  ;;  %v334_v37 = vadd.f32 %v254_v22, %v110_v10  ;;  %v245_v54 = vsel %vm925_vm9, %v242_v1, %v239_v18  ;;  %v210_v42 = vadd.f32 1.0, %v572_v26  ;;  %v213_v28 = vmul.f32 -0.5, %v572_v26  ;;  %v346_v22 = vld [vmem:[#allocation6 + $0x18] sm:$0xff] }
  0x4d   :  { %v333_v11 = vadd.f32 %v245_v54, %v109_v0  ;;  %v236_v25 = vsel %vm933_vm10, %v233_v62, %v230_v3  ;;  %v574_v7 = vpop.eup %573  ;;  %v216_v32 = vand.u32 2147483647, %v572_v26  ;;  %v486_v41 = vunpack.c.l.bf16 %v912_v29  ;;  %v347_v62 = vld [vmem:[#allocation6 + $0x20] sm:$0xff]  ;;  %v424_v8 = vld [vmem:[#allocation3] sm:$0xff] }
  0x4e   :  { %v398_v36 = vmul.f32 %v491_v13, %v334_v37  ;;  %577 = vlog2.f32 %v210_v42  ;;  %v332_v40 = vadd.f32 %v236_v25, %v108_v20  ;;  %v221_v0 = vmul.f32 0.6931472, %v574_v7 }
  0x4f   :  { %v214_v50 = vadd.f32 1.0, %v213_v28  ;;  %v397_v38 = vmul.f32 %v490_v33, %v333_v11  ;;  %v119_v13 = vand.u32 2147483647, %v951_v24  ;;  %vm968_vm12 = vcmp.lt.f32.partialorder %v216_v32, 0.0004427343  ;;  %v345_v11 = vld [vmem:[#allocation6 + $0x10] sm:$0xff] }
  0x50   :  { %432 = vmatpush.xpose.msra.mxu0 %v415_v34  ;;  %v414_v35 = vadd.f32 %v398_v36, %v350_v5  ;;  %v576_v47 = vpop.eup %575  ;;  %v227_v4 = vsel %vm955_vm11, %v224_v27, %v221_v0  ;;  %579 = vpow2.f32 %v153_v44  ;;  %v396_v52 = vmul.f32 %v487_v48, %v332_v40  ;;  %v477_v27 = vld [vmem:[#allocation9] sm:$0xff]  }
  0x51   :  { %v201_v20 = vadd.f32 1.0, %v576_v47  ;;  %v204_v46 = vmul.f32 -0.5, %v576_v47  ;;  %v215_v57 = vmul.f32 %v572_v26, %v214_v50  ;;  %v135_v51 = vsub.f32 0.0, %v119_v13  ;;  %v344_v13 = vld [vmem:[#allocation6 + $0x8] sm:$0xff] }
  0x52   :  { %v413_v43 = vadd.f32 %v397_v38, %v349_v17  ;;  %v331_v53 = vadd.f32 %v227_v4, %v107_v19  ;;  %v207_v61 = vand.u32 2147483647, %v576_v47  ;;  %v412_v1 = vadd.f32 %v396_v52, %v348_v49 }
  0x53   :  { %581 = vlog2.f32 %v201_v20  ;;  %v205_v59 = vadd.f32 1.0, %v204_v46  ;;  %v151_v12 = vmul.f32 1.442695, %v135_v51  ;;  %v483_v9 = vunpack.c.h.bf16 %v508_v56  ;;  %v343_v20 = vld [vmem:[#allocation6] sm:$0xff] }
  0x54   :  { %v578_v33 = vpop.eup %577  ;;  %433 = vmatpush.xpose.msra.mxu0 %v414_v35  ;;  %v395_v63 = vmul.f32 %v486_v41, %v331_v53  ;;  %v105_v14 = vmax.f32 %v908_v15, 0.0  ;;  %vm208_vm13 = vcmp.lt.f32.partialorder %v207_v61, 0.0004427343  ;;  %v482_v23 = vunpack.c.l.bf16 %v508_v56 }
  0x55   :  { %v212_v55 = vmul.f32 0.6931472, %v578_v33  ;;  %583 = vpow2.f32 %v151_v12  ;;  %v206_v29 = vmul.f32 %v576_v47, %v205_v59  ;;  %v104_v36 = vmax.f32 %v929_v60, 0.0 }
  0x56   :  { %v580_v30 = vpop.eup %579  ;;  %v411_v18 = vadd.f32 %v395_v63, %v347_v62  ;;  %v479_v0 = vunpack.c.h.bf16 %v477_v27  ;;  %v103_v44 = vmax.f32 %v951_v24, 0.0  ;;  %v478_v4 = vunpack.c.l.bf16 %v477_v27  ;;  %v524_v24 = vld [vmem:[%s989_s4] ss:$0 sm:$0xff] }
  0x57   :  { %v218_v58 = vsel %vm968_vm12, %v215_v57, %v212_v55  ;;  %v192_v2 = vadd.f32 1.0, %v580_v30  ;;  %v195_v16 = vmul.f32 -0.5, %v580_v30  ;;  %v198_v37 = vand.u32 2147483647, %v580_v30 }
  0x58   :  { %434 = vmatpush.xpose.msra.mxu0 %v413_v43  ;;  %v330_v6 = vadd.f32 %v218_v58, %v106_v45 }
  0x59   :  { %v582_v48 = vpop.eup %581  ;;  %585 = vlog2.f32 %v192_v2  ;;  %v196_v19 = vadd.f32 1.0, %v195_v16  ;;  %vm199_vm14 = vcmp.lt.f32.partialorder %v198_v37, 0.0004427343 }
  0x5a   :  { %v203_v21 = vmul.f32 0.6931472, %v582_v48  ;;  %v394_v31 = vmul.f32 %v483_v9, %v330_v6 }
  0x5b   :  { %v584_v26 = vpop.eup %583  ;;  %v197_v25 = vmul.f32 %v580_v30, %v196_v19 }
  0x5c   :  { %435 = vmatpush.xpose.msra.mxu0 %v412_v1  ;;  %v209_v3 = vsel %vm208_vm13, %v206_v29, %v203_v21  ;;  %v183_v54 = vadd.f32 1.0, %v584_v26  ;;  %v186_v42 = vmul.f32 -0.5, %v584_v26  ;;  %v410_v5 = vadd.f32 %v394_v31, %v346_v22 }
  0x5d   :  { %v329_v34 = vadd.f32 %v209_v3, %v105_v14  ;;  %v189_v10 = vand.u32 2147483647, %v584_v26 }
  0x5e   :  { %587 = vlog2.f32 %v183_v54  ;;  %v187_v28 = vadd.f32 1.0, %v186_v42 }
  0x5f   :  { %v393_v15 = vmul.f32 %v482_v23, %v329_v34  ;;  %v586_v7 = vpop.eup %585  ;;  %vm190_vm15 = vcmp.lt.f32.partialorder %v189_v10, 0.0004427343 }
  0x60   :  { %436 = vmatpush.xpose.msra.mxu0 %v411_v18  ;;  %v194_v39 = vmul.f32 0.6931472, %v586_v7  ;;  %v188_v32 = vmul.f32 %v584_v26, %v187_v28 }
  0x61   :  { %v409_v40 = vadd.f32 %v393_v15, %v345_v11 }
  0x62   :  { %v200_v50 = vsel %vm199_vm14, %v197_v25, %v194_v39 }
  0x63   :  { %v328_v38 = vadd.f32 %v200_v50, %v104_v36 }
  0x64   :  { %437 = vmatpush.xpose.msra.mxu0 %v410_v5  ;;  %v588_v35 = vpop.eup %587 }
  0x65   :  { %v185_v47 = vmul.f32 0.6931472, %v588_v35  ;;  %v392_v17 = vmul.f32 %v479_v0, %v328_v38 }
  0x67   :  { %v191_v41 = vsel %vm190_vm15, %v188_v32, %v185_v47  ;;  %v408_v60 = vadd.f32 %v392_v17, %v344_v13 }
  0x68   :  { %438 = vmatpush.xpose.msra.mxu0 %v409_v40  ;;  %v327_v45 = vadd.f32 %v191_v41, %v103_v44 }
  0x6a   :  { %v391_v46 = vmul.f32 %v478_v4, %v327_v45 }
  0x6c   :  { %439 = vmatpush.xpose.msra.mxu0 %v408_v60  ;;  %v407_v57 = vadd.f32 %v391_v46, %v343_v20 }
  0x70   :  { %440 = vmatpush.xpose.msra.mxu0 %v407_v57 }
  0x73   :  { %441 = vmatmul.f32.vlgmr.msra.gmra.mxu0 %v424_v8 }
  0xf0   :  { %v442_v51 = vpop.f32.mrf.mxu0 }
  0xf1   :  { %v455_v33 = vadd.f32 %v524_v24, %v442_v51 }
  0xf3   :  { %456 = vst [vmem:[#allocation11] sm:$0xff] %v455_v33 }
  0xf4   :  { %467 = dma.vmem_to_hbm [thread:$0]  %s463_s16, 128, %s465_s19, [#allocation5]  }
  0xf5   :  { %715 = dma.done.wait [#allocation5], 128  }
  0xf6   :  { %716 = vsyncadd [#allocation5], 4294967168 }
  0xf7   :  { %472 = vsyncpa [#allocation4], 1 }
  0xf8   :  { %473 = vsyncpa [#allocation7], 1 }
  0xf9   :  { %474 = vsyncpa [#allocation10], 1 }
  0xfa   :  { %475 = vsyncpa [#allocation5], 1 }

</bundles_post_ra>
